<compile_context>
chip_gen: v6e
topology: v6e:2x2x1
jax: 0.10.0
libtpu: 0.0.40
codegen_flags: <defaults>
</compile_context>

<pallas_src>
import jax
import jax.numpy as jnp
from jax.experimental import pallas as pl
from jax.experimental.pallas import tpu as pltpu


def _round_up(x, m):
    return ((x + m - 1) // m) * m


# ----------------------------------------------------------------------------
# Pallas kernel: fused 4-layer MLP  (Linear->ReLU x3, then Linear).
# All matmuls are bf16 x bf16 -> f32 on the MXU; bias + ReLU run in f32 on the
# VPU, then activations are narrowed back to bf16 between layers.
# ----------------------------------------------------------------------------
def qcritic_kernel(x_ref,
                   w1_ref, b1_ref,
                   w2_ref, b2_ref,
                   w3_ref, b3_ref,
                   w4_ref, b4_ref,
                   o_ref):
    # Layer 1: (tile, 32) @ (32, 256)
    h = jnp.dot(x_ref[...], w1_ref[...],
                preferred_element_type=jnp.float32) + b1_ref[...]
    h = jnp.maximum(h, 0.0).astype(jnp.bfloat16)

    # Layer 2: (tile, 256) @ (256, 512)
    h = jnp.dot(h, w2_ref[...],
                preferred_element_type=jnp.float32) + b2_ref[...]
    h = jnp.maximum(h, 0.0).astype(jnp.bfloat16)

    # Layer 3: (tile, 512) @ (512, 256)
    h = jnp.dot(h, w3_ref[...],
                preferred_element_type=jnp.float32) + b3_ref[...]
    h = jnp.maximum(h, 0.0).astype(jnp.bfloat16)

    # Layer 4: (tile, 256) @ (256, 128-padded-output), no activation.
    out = jnp.dot(h, w4_ref[...],
                  preferred_element_type=jnp.float32) + b4_ref[...]
    o_ref[...] = out.astype(o_ref.dtype)


def _choose_tile(B, max_tile):
    """Batch tile: big enough to amortize per-step overhead, >=2 steps on big
    batches so v7x can shard the 'parallel' axis across both TensorCores."""
    max_tile = max(8, _round_up(max_tile, 8))
    if B <= 256:
        # Small batch: a single step covering everything (8-row sublane align).
        return min(max_tile, _round_up(B, 8))
    n_steps = max(2, pl.cdiv(B, max_tile))
    return min(max_tile, _round_up(pl.cdiv(B, n_steps), 8))


def qcritic_forward(state, action, params, *, batch_tile=1024):
    """Pallas-backed equivalent of QCritic.forward(state, action)."""
    B, state_dim = state.shape
    Ba, action_dim = action.shape
    assert Ba == B, "state/action batch mismatch"
    (w1, b1), (w2, b2), (w3, b3), (w4, b4) = params
    D_in = state_dim + action_dim
    assert w1.shape[0] == D_in, "input_dim must equal state_dim + action_dim"
    D_out = w4.shape[1]

    # Fused concat + bf16 cast on the wrapper side (single input DMA stream).
    x = jnp.concatenate([state, action], axis=-1).astype(jnp.bfloat16)

    # Lane-dense output: pad layer-4 weights/bias to a multiple of 128 lanes.
    N_pad = _round_up(max(D_out, 128), 128)
    w4p = jnp.pad(w4, ((0, 0), (0, N_pad - D_out)))
    b4p = jnp.pad(b4, ((0, 0), (0, N_pad - D_out)))

    # Batch tiling / padding.
    tile = _choose_tile(B, batch_tile)
    B_pad = _round_up(B, tile)
    if B_pad != B:
        x = jnp.pad(x, ((0, B_pad - B), (0, 0)))
    grid = (B_pad // tile,)

    def replicated(arr):
        nd = arr.ndim
        # Grid-invariant block (always block 0): weights/biases stay resident.
        return pl.BlockSpec(arr.shape, lambda i, _nd=nd: (0,) * _nd)

    compiler_kwargs = dict(dimension_semantics=("parallel",))
    if tile > 512:
        # v5e's default scoped VMEM is 16 MiB; give explicit headroom.
        compiler_kwargs["vmem_limit_bytes"] = 32 * 1024 * 1024

    out = pl.pallas_call(
        qcritic_kernel,
        out_shape=jax.ShapeDtypeStruct((B_pad, N_pad), jnp.float32),
        grid_spec=pltpu.PrefetchScalarGridSpec(
            num_scalar_prefetch=0,
            grid=grid,
            in_specs=[
                pl.BlockSpec((tile, D_in), lambda i: (i, 0)),
                replicated(w1), replicated(b1),
                replicated(w2), replicated(b2),
                replicated(w3), replicated(b3),
                replicated(w4p), replicated(b4p),
            ],
            out_specs=pl.BlockSpec((tile, N_pad), lambda i: (i, 0)),
        ),
        compiler_params=pltpu.CompilerParams(**compiler_kwargs),
    )(x, w1, b1, w2, b2, w3, b3, w4p, b4p)
    return out[:B, :D_out]


# ----------------------------------------------------------------------------
# Deterministic parameter initialization (mimics nn.Linear default init).
# Weights stored in bf16 (MXU-native); biases kept in f32.
# TODO(synk): keep w4/b4 (and w1) in f32 if bit-closer parity with the f32
#             PyTorch module is ever required; the MXU accumulates f32 anyway.
# ----------------------------------------------------------------------------
def init_linear(key, fan_in, fan_out, w_dtype=jnp.bfloat16):
    kw, kb = jax.random.split(key)
    bound = 1.0 / jnp.sqrt(float(fan_in))
    w = jax.random.uniform(kw, (fan_in, fan_out), jnp.float32,
                           -bound, bound).astype(w_dtype)
    b = jax.random.uniform(kb, (1, fan_out), jnp.float32, -bound, bound)
    return w, b


def init_qcritic_params(key, input_dim, output_dim):
    dims = [(input_dim, 256), (256, 512), (512, 256), (256, output_dim)]
    keys = jax.random.split(key, len(dims))
    return [init_linear(k, fi, fo) for k, (fi, fo) in zip(keys, dims)]


def qcritic_reference(state, action, params):
    """Pure-JAX (f32) reference for correctness checking."""
    x = jnp.concatenate([state, action], axis=-1).astype(jnp.float32)
    (w1, b1), (w2, b2), (w3, b3), (w4, b4) = params

    def lin(h, w, b):
        return h @ w.astype(jnp.float32) + b

    h = jnp.maximum(lin(x, w1, b1), 0.0)
    h = jnp.maximum(lin(h, w2, b2), 0.0)
    h = jnp.maximum(lin(h, w3, b3), 0.0)
    return lin(h, w4, b4)


if __name__ == "__main__":
    key = jax.random.PRNGKey(0)
    k_params, k_state, k_action = jax.random.split(key, 3)

    state_dim = 24
    action_dim = 8          # input_dim = state_dim + action_dim = 32
    output_dim = 4
    params = init_qcritic_params(k_params, state_dim + action_dim, output_dim)

    # Case 1: tiny batch (tile clamps to 8 rows, grid = (1,)).
    batch = 8
    state = jax.random.normal(k_state, (batch, state_dim), jnp.float32)
    action = jax.random.normal(k_action, (batch, action_dim), jnp.float32)
    out = jax.block_until_ready(qcritic_forward(state, action, params))
    ref = qcritic_reference(state, action, params)
    assert out.shape == (batch, output_dim)
    assert jnp.allclose(out, ref, atol=5e-2, rtol=5e-2), "mismatch (case 1)"

    # Case 2: non-multiple batch, <= 256 rows -> single-step padded grid.
    k_s2, k_a2 = jax.random.split(jax.random.PRNGKey(1))
    batch2 = 200
    state2 = jax.random.normal(k_s2, (batch2, state_dim), jnp.float32)
    action2 = jax.random.normal(k_a2, (batch2, action_dim), jnp.float32)
    out2 = jax.block_until_ready(qcritic_forward(state2, action2, params))
    ref2 = qcritic_reference(state2, action2, params)
    assert out2.shape == (batch2, output_dim)
    assert jnp.allclose(out2, ref2, atol=5e-2, rtol=5e-2), "mismatch (case 2)"

    # Case 3: batch > 256 -> multi-step 'parallel' grid (>=2 steps for v7x).
    k_s3, k_a3 = jax.random.split(jax.random.PRNGKey(2))
    batch3 = 300
    state3 = jax.random.normal(k_s3, (batch3, state_dim), jnp.float32)
    action3 = jax.random.normal(k_a3, (batch3, action_dim), jnp.float32)
    out3 = jax.block_until_ready(qcritic_forward(state3, action3, params))
    ref3 = qcritic_reference(state3, action3, params)
    assert out3.shape == (batch3, output_dim)
    assert jnp.allclose(out3, ref3, atol=5e-2, rtol=5e-2), "mismatch (case 3)"

    print("KERNEL_OK")
</pallas_src>

<mosaic_0001>
module attributes {stable_mosaic.version = 11 : i64} {
  func.func @qcritic_kernel(%arg0: i32, %arg1: memref<8x32xbf16, #tpu.memory_space<vmem>>, %arg2: memref<32x256xbf16, #tpu.memory_space<vmem>>, %arg3: memref<1x256xf32, #tpu.memory_space<vmem>>, %arg4: memref<256x512xbf16, #tpu.memory_space<vmem>>, %arg5: memref<1x512xf32, #tpu.memory_space<vmem>>, %arg6: memref<512x256xbf16, #tpu.memory_space<vmem>>, %arg7: memref<1x256xf32, #tpu.memory_space<vmem>>, %arg8: memref<256x128xbf16, #tpu.memory_space<vmem>>, %arg9: memref<1x128xf32, #tpu.memory_space<vmem>>, %arg10: memref<8x128xf32, #tpu.memory_space<vmem>>) attributes {dimension_semantics = [#tpu.dimension_semantics<parallel>], iteration_bounds = array<i64: 1>, scalar_prefetch = 0 : i64, scratch_operands = 0 : i64, tpu.core_type = #tpu.core_type<tc>, window_params = [{transform_indices = @transform_0, window_bounds = array<i64: 8, 32>}, {pipeline_mode = #tpu.pipeline_mode<synchronous>, transform_indices = @transform_1, window_bounds = array<i64: 32, 256>}, {pipeline_mode = #tpu.pipeline_mode<synchronous>, transform_indices = @transform_2, window_bounds = array<i64: 1, 256>}, {pipeline_mode = #tpu.pipeline_mode<synchronous>, transform_indices = @transform_3, window_bounds = array<i64: 256, 512>}, {pipeline_mode = #tpu.pipeline_mode<synchronous>, transform_indices = @transform_4, window_bounds = array<i64: 1, 512>}, {pipeline_mode = #tpu.pipeline_mode<synchronous>, transform_indices = @transform_5, window_bounds = array<i64: 512, 256>}, {pipeline_mode = #tpu.pipeline_mode<synchronous>, transform_indices = @transform_6, window_bounds = array<i64: 1, 256>}, {pipeline_mode = #tpu.pipeline_mode<synchronous>, transform_indices = @transform_7, window_bounds = array<i64: 256, 128>}, {pipeline_mode = #tpu.pipeline_mode<synchronous>, transform_indices = @transform_8, window_bounds = array<i64: 1, 128>}, {transform_indices = @transform_9, window_bounds = array<i64: 8, 128>}]} {
    %c0 = arith.constant 0 : index
    %c0_0 = arith.constant 0 : index
    %0 = vector.load %arg1[%c0, %c0_0] : memref<8x32xbf16, #tpu.memory_space<vmem>>, vector<8x32xbf16>
    %c0_1 = arith.constant 0 : index
    %c0_2 = arith.constant 0 : index
    %1 = vector.load %arg2[%c0_1, %c0_2] : memref<32x256xbf16, #tpu.memory_space<vmem>>, vector<32x256xbf16>
    %cst = arith.constant dense<0.000000e+00> : vector<8x256xf32>
    %2 = tpu.matmul %0, %1, %cst {dimension_numbers = #tpu.dot_dimension_numbers<[1], [0], [0], [1], [0, 0, 1, 1], [], []>} : vector<8x32xbf16>, vector<32x256xbf16>, vector<8x256xf32> -> vector<8x256xf32>
    %c0_3 = arith.constant 0 : index
    %c0_4 = arith.constant 0 : index
    %3 = vector.load %arg3[%c0_3, %c0_4] : memref<1x256xf32, #tpu.memory_space<vmem>>, vector<1x256xf32>
    %4 = vector.broadcast %3 : vector<1x256xf32> to vector<8x256xf32>
    %5 = arith.addf %2, %4 : vector<8x256xf32>
    %cst_5 = arith.constant 0.000000e+00 : f32
    %6 = vector.broadcast %cst_5 : f32 to vector<8x256xf32>
    %7 = arith.maximumf %5, %6 : vector<8x256xf32>
    %8 = arith.truncf %7 : vector<8x256xf32> to vector<8x256xbf16>
    %c0_6 = arith.constant 0 : index
    %c0_7 = arith.constant 0 : index
    %9 = vector.load %arg4[%c0_6, %c0_7] : memref<256x512xbf16, #tpu.memory_space<vmem>>, vector<256x512xbf16>
    %cst_8 = arith.constant dense<0.000000e+00> : vector<8x512xf32>
    %10 = tpu.matmul %8, %9, %cst_8 {dimension_numbers = #tpu.dot_dimension_numbers<[1], [0], [0], [1], [0, 0, 1, 1], [], []>} : vector<8x256xbf16>, vector<256x512xbf16>, vector<8x512xf32> -> vector<8x512xf32>
    %c0_9 = arith.constant 0 : index
    %c0_10 = arith.constant 0 : index
    %11 = vector.load %arg5[%c0_9, %c0_10] : memref<1x512xf32, #tpu.memory_space<vmem>>, vector<1x512xf32>
    %12 = vector.broadcast %11 : vector<1x512xf32> to vector<8x512xf32>
    %13 = arith.addf %10, %12 : vector<8x512xf32>
    %cst_11 = arith.constant 0.000000e+00 : f32
    %14 = vector.broadcast %cst_11 : f32 to vector<8x512xf32>
    %15 = arith.maximumf %13, %14 : vector<8x512xf32>
    %16 = arith.truncf %15 : vector<8x512xf32> to vector<8x512xbf16>
    %c0_12 = arith.constant 0 : index
    %c0_13 = arith.constant 0 : index
    %17 = vector.load %arg6[%c0_12, %c0_13] : memref<512x256xbf16, #tpu.memory_space<vmem>>, vector<512x256xbf16>
    %cst_14 = arith.constant dense<0.000000e+00> : vector<8x256xf32>
    %18 = tpu.matmul %16, %17, %cst_14 {dimension_numbers = #tpu.dot_dimension_numbers<[1], [0], [0], [1], [0, 0, 1, 1], [], []>} : vector<8x512xbf16>, vector<512x256xbf16>, vector<8x256xf32> -> vector<8x256xf32>
    %c0_15 = arith.constant 0 : index
    %c0_16 = arith.constant 0 : index
    %19 = vector.load %arg7[%c0_15, %c0_16] : memref<1x256xf32, #tpu.memory_space<vmem>>, vector<1x256xf32>
    %20 = vector.broadcast %19 : vector<1x256xf32> to vector<8x256xf32>
    %21 = arith.addf %18, %20 : vector<8x256xf32>
    %cst_17 = arith.constant 0.000000e+00 : f32
    %22 = vector.broadcast %cst_17 : f32 to vector<8x256xf32>
    %23 = arith.maximumf %21, %22 : vector<8x256xf32>
    %24 = arith.truncf %23 : vector<8x256xf32> to vector<8x256xbf16>
    %c0_18 = arith.constant 0 : index
    %c0_19 = arith.constant 0 : index
    %25 = vector.load %arg8[%c0_18, %c0_19] : memref<256x128xbf16, #tpu.memory_space<vmem>>, vector<256x128xbf16>
    %cst_20 = arith.constant dense<0.000000e+00> : vector<8x128xf32>
    %26 = tpu.matmul %24, %25, %cst_20 {dimension_numbers = #tpu.dot_dimension_numbers<[1], [0], [0], [1], [0, 0, 1, 1], [], []>} : vector<8x256xbf16>, vector<256x128xbf16>, vector<8x128xf32> -> vector<8x128xf32>
    %c0_21 = arith.constant 0 : index
    %c0_22 = arith.constant 0 : index
    %27 = vector.load %arg9[%c0_21, %c0_22] : memref<1x128xf32, #tpu.memory_space<vmem>>, vector<1x128xf32>
    %28 = vector.broadcast %27 : vector<1x128xf32> to vector<8x128xf32>
    %29 = arith.addf %26, %28 : vector<8x128xf32>
    %c0_23 = arith.constant 0 : index
    %c0_24 = arith.constant 0 : index
    %30 = vector.load %arg10[%c0_23, %c0_24] : memref<8x128xf32, #tpu.memory_space<vmem>>, vector<8x128xf32>
    tpu.vector_store %arg10[%c0_23, %c0_24], %29 {strides = array<i32>} : memref<8x128xf32, #tpu.memory_space<vmem>>, vector<8x128xf32>,
    return
  }
  func.func @transform_0(%arg0: i32) -> (i32, i32) {
    %c0_i32 = arith.constant 0 : i32
    %c0_i32_0 = arith.constant 0 : i32
    return %arg0, %c0_i32 : i32, i32
  }
  func.func @transform_1(%arg0: i32) -> (i32, i32) {
    %c0_i32 = arith.constant 0 : i32
    %c0_i32_0 = arith.constant 0 : i32
    %c0_i32_1 = arith.constant 0 : i32
    return %c0_i32, %c0_i32_0 : i32, i32
  }
  func.func @transform_2(%arg0: i32) -> (i32, i32) {
    %c0_i32 = arith.constant 0 : i32
    %c0_i32_0 = arith.constant 0 : i32
    %c0_i32_1 = arith.constant 0 : i32
    return %c0_i32, %c0_i32_0 : i32, i32
  }
  func.func @transform_3(%arg0: i32) -> (i32, i32) {
    %c0_i32 = arith.constant 0 : i32
    %c0_i32_0 = arith.constant 0 : i32
    %c0_i32_1 = arith.constant 0 : i32
    return %c0_i32, %c0_i32_0 : i32, i32
  }
  func.func @transform_4(%arg0: i32) -> (i32, i32) {
    %c0_i32 = arith.constant 0 : i32
    %c0_i32_0 = arith.constant 0 : i32
    %c0_i32_1 = arith.constant 0 : i32
    return %c0_i32, %c0_i32_0 : i32, i32
  }
  func.func @transform_5(%arg0: i32) -> (i32, i32) {
    %c0_i32 = arith.constant 0 : i32
    %c0_i32_0 = arith.constant 0 : i32
    %c0_i32_1 = arith.constant 0 : i32
    return %c0_i32, %c0_i32_0 : i32, i32
  }
  func.func @transform_6(%arg0: i32) -> (i32, i32) {
    %c0_i32 = arith.constant 0 : i32
    %c0_i32_0 = arith.constant 0 : i32
    %c0_i32_1 = arith.constant 0 : i32
    return %c0_i32, %c0_i32_0 : i32, i32
  }
  func.func @transform_7(%arg0: i32) -> (i32, i32) {
    %c0_i32 = arith.constant 0 : i32
    %c0_i32_0 = arith.constant 0 : i32
    %c0_i32_1 = arith.constant 0 : i32
    return %c0_i32, %c0_i32_0 : i32, i32
  }
  func.func @transform_8(%arg0: i32) -> (i32, i32) {
    %c0_i32 = arith.constant 0 : i32
    %c0_i32_0 = arith.constant 0 : i32
    %c0_i32_1 = arith.constant 0 : i32
    return %c0_i32, %c0_i32_0 : i32, i32
  }
  func.func @transform_9(%arg0: i32) -> (i32, i32) {
    %c0_i32 = arith.constant 0 : i32
    %c0_i32_0 = arith.constant 0 : i32
    return %arg0, %c0_i32 : i32, i32
  }
}

</mosaic_0001>

<bundles_post_ra>
// kernel: tpu_custom_call.1
= control target key start
LH: loop header
LB: loop body
LE: loop exit
PB: predicated region body
PF: predicated region fallthrough
CT: control target
= control target key end

     0   :  { %14 = vsyncpa [#allocation3], 0  ;;  %s1993_s0 = inlined_call_operand.hbm [shape: bf16[8,32], index: 0, kind: input, shape index: {}]   ;;  %s1994_s1 = inlined_call_operand.hbm [shape: bf16[32,256], index: 1, kind: input, shape index: {}]   ;;  %s1995_s2 = inlined_call_operand.vmem [shape: f32[1,256], index: 2, kind: input, shape index: {}]   ;;  %s1996_s3 = inlined_call_operand.hbm [shape: bf16[256,512], index: 3, kind: input, shape index: {}]   ;;  %s1997_s4 = inlined_call_operand.vmem [shape: f32[1,512], index: 4, kind: input, shape index: {}]   ;;  %s1998_s5 = inlined_call_operand.hbm [shape: bf16[512,256], index: 5, kind: input, shape index: {}]   ;;  %s1999_s6 = inlined_call_operand.vmem [shape: f32[1,256], index: 6, kind: input, shape index: {}]   ;;  %s2000_s7 = inlined_call_operand.hbm [shape: bf16[256,128], index: 7, kind: input, shape index: {}]   ;;  %s2001_s8 = inlined_call_operand.vmem [shape: f32[1,128], index: 8, kind: input, shape index: {}]   ;;  %s2002_s9 = inlined_call_operand.hbm [shape: f32[8,128], index: 9, kind: output, shape index: {}]  }
   0x1   :  { %15 = vsyncpa [#allocation6], 0 }
   0x2   :  { %16 = vsyncpa [#allocation9], 0 }
   0x3   :  { %17 = vsyncpa [#allocation4], 0  ;;  %s1884_s30 = smov [#allocation5]  }
   0x4   :  { %s33_s10 = sshll.u32 %s1884_s30, 4  ;;  %s34_s10 = int_to_ptr.vmem [resolvable:$true] %s33_s10 }
   0x5   :  { %s1764_s11 = scalar_lea.vmem %s34_s10, 512  ;;  %p1769_p1 = scmp.lt.s32.totalorder %s34_s10, %s34_s10 }
   0x6   :  { %p1765_p0 = scmp.ne.s32.totalorder %s34_s10, %s1764_s11  ;;  %p1770_p2 = scmp.lt.s32.totalorder %s1764_s11, %s1764_s11 }
   0x8   :  { %p1771_p3 = por %p1770_p2, %p1769_p1 }
   0xa   :  { %p1772_p4 = pnand %p1771_p3, %p1765_p0 }
   0xc   :  { %1775 = shalt.err (!%p1772_p4)
}
   0xd   :  { %s1885_s12 = smov 128   ;;  %s1886_s13 = smov 8  }
   0xe   :  { %39 = dma.hbm_to_vmem [thread:$0]  %s1994_s1, 512, %s34_s10, [#allocation6], %s1885_s12, %s1885_s12, %s1886_s13  }
   0xf   :  { %s1887_s16 = smov [#allocation8]   ;;  %s1888_s18 = smov [#allocation2]  }
  0x10   :  { %s61_s17 = sshll.u32 %s1887_s16, 4  ;;  %s24_s19 = sshll.u32 %s1888_s18, 4  ;;  %s62_s17 = int_to_ptr.vmem [resolvable:$true] %s61_s17  ;;  %s25_s19 = int_to_ptr.vmem [resolvable:$true] %s24_s19 }
  0x11   :  { %s1784_s20 = scalar_lea.vmem %s62_s17, 8192  ;;  %p1789_p6 = scmp.lt.s32.totalorder %s62_s17, %s62_s17 }
  0x12   :  { %p1785_p5 = scmp.ne.s32.totalorder %s62_s17, %s1784_s20  ;;  %p1790_p7 = scmp.lt.s32.totalorder %s1784_s20, %s1784_s20 }
  0x14   :  { %p1791_p8 = por %p1790_p7, %p1789_p6 }
  0x16   :  { %p1792_p9 = pnand %p1791_p8, %p1785_p5 }
  0x18   :  { %1795 = shalt.err (!%p1792_p9)
}
  0x19   :  { %67 = dma.hbm_to_vmem [thread:$0]  %s1998_s5, 8192, %s62_s17, [#allocation9], %s1885_s12, %s1885_s12, %s1886_s13  }
  0x1a   :  { %s1804_s23 = scalar_lea.vmem %s25_s19, 64  ;;  %p1809_p11 = scmp.lt.s32.totalorder %s25_s19, %s25_s19 }
  0x1b   :  { %p1805_p10 = scmp.ne.s32.totalorder %s25_s19, %s1804_s23  ;;  %p1810_p12 = scmp.lt.s32.totalorder %s1804_s23, %s1804_s23 }
  0x1d   :  { %p1811_p13 = por %p1810_p12, %p1809_p11 }
  0x1f   :  { %p1812_p0 = pnand %p1811_p13, %p1805_p10 }
  0x21   :  { %1815 = shalt.err (!%p1812_p0)
}
  0x22   :  { %27 = dma.hbm_to_vmem [thread:$0]  %s1993_s0, 64, %s25_s19, [#allocation3]  }
  0x23   :  { %s1889_s25 = smov [#allocation7]  }
  0x24   :  { %s47_s26 = sshll.u32 %s1889_s25, 4  ;;  %s48_s26 = int_to_ptr.vmem [resolvable:$true] %s47_s26 }
  0x25   :  { %s1824_s27 = scalar_lea.vmem %s48_s26, 8192  ;;  %p1829_p2 = scmp.lt.s32.totalorder %s48_s26, %s48_s26 }
  0x26   :  { %p1825_p1 = scmp.ne.s32.totalorder %s48_s26, %s1824_s27  ;;  %p1830_p3 = scmp.lt.s32.totalorder %s1824_s27, %s1824_s27 }
  0x28   :  { %p1831_p4 = por %p1830_p3, %p1829_p2 }
  0x2a   :  { %p1832_p5 = pnand %p1831_p4, %p1825_p1 }
  0x2c   :  { %1835 = shalt.err (!%p1832_p5)
}
  0x2d   :  { %s1890_s5 = smov 256   ;;  %s1891_s28 = smov 16  }
  0x2e   :  { %53 = dma.hbm_to_vmem [thread:$0]  %s1996_s3, 8192, %s48_s26, [#allocation6], %s1890_s5, %s1890_s5, %s1891_s28  }
  0x2f   :  { %s1892_s10 = smov [#allocation10]  }
  0x30   :  { %s75_s11 = sshll.u32 %s1892_s10, 4  ;;  %s76_s11 = int_to_ptr.vmem [resolvable:$true] %s75_s11 }
  0x31   :  { %s1844_s0 = scalar_lea.vmem %s76_s11, 2048  ;;  %p1849_p7 = scmp.lt.s32.totalorder %s76_s11, %s76_s11 }
  0x32   :  { %p1845_p6 = scmp.ne.s32.totalorder %s76_s11, %s1844_s0  ;;  %p1850_p8 = scmp.lt.s32.totalorder %s1844_s0, %s1844_s0 }
  0x34   :  { %p1851_p9 = por %p1850_p8, %p1849_p7 }
  0x36   :  { %p1852_p10 = pnand %p1851_p9, %p1845_p6 }
  0x38   :  { %1855 = shalt.err (!%p1852_p10)
}
  0x39   :  { %s1893_s12 = smov 64   ;;  %s1894_s13 = smov 4  }
  0x3a   :  { %81 = dma.hbm_to_vmem [thread:$0]  %s2000_s7, 2048, %s76_s11, [#allocation9], %s1893_s12, %s1893_s12, %s1894_s13  }
  0x3b   :  { %1876 = dma.done.wait [#allocation3], 64  }
  0x3c   :  { %1877 = vsyncadd [#allocation3], 4294967232 }
  0x3d   :  { %1878 = dma.done.wait [#allocation6], 8704  }
  0x3e   :  { %1879 = vsyncadd [#allocation6], 4294958592 }
  0x3f   :  { %1880 = dma.done.wait [#allocation9], 10240  }
  0x40   :  { %1881 = vsyncadd [#allocation9], 4294957056  ;;  %v1895_v0 = vmov 0   ;;  %v1542_v1 = vld [vmem:[#allocation5 + $0x14] ss:$8 sps:$4 sm:$0xff]   ;;  %vm137_vm0 = vcmask 261120  }
  0x41   :  { %173 = vmatprep.mubr.bf16.mxu0 %v1895_v0  ;;  %v1544_v2 = vld [vmem:[#allocation5 + $0x10] ss:$8 sps:$4 sm:$0xff]   ;;  %153 = vmatprep.subr.bf16.mxu0 %v1542_v1  ;;  %v1545_v3 = vld [vmem:[#allocation5 + $0x4] ss:$8 sps:$4 sm:$0xff]   ;;  %v1547_v4 = vld [vmem:[#allocation5] ss:$8 sps:$4 sm:$0xff]  }
  0x42   :  { %154 = vmatpush1.bf16.msra.mxu0 %v1544_v2  ;;  %v1548_v5 = vld [vmem:[#allocation7 + $0xe4] ss:$16 sps:$4 sm:$0xff]   ;;  %v100_v6 = vld [vmem:[#allocation2] sm:$0xf]  ;;  %v1553_v8 = vld [vmem:[#allocation7 + $0xe0] ss:$16 sps:$4 sm:$0xff]  }
  0x43   :  { %155 = vmatprep.subr.bf16.mxu0 %v1545_v3  ;;  %592 = vmatprep.subr.bf16.mxu1 %v1548_v5  ;;  %v1552_v7 = vld [vmem:[#allocation7 + $0xec] ss:$16 sps:$4 sm:$0xff]   ;;  %v1554_v9 = vld [vmem:[#allocation7 + $0xc4] ss:$16 sps:$4 sm:$0xff]   ;;  %v1550_v10 = vld [vmem:[#allocation7 + $0xe8] ss:$16 sps:$4 sm:$0xff]  }
  0x44   :  { %593 = vmatpush1.bf16.msra.mxu1 %v1553_v8  ;;  %v1558_v11 = vld [vmem:[#allocation7 + $0xcc] ss:$16 sps:$4 sm:$0xff]   ;;  %v1559_v12 = vld [vmem:[#allocation7 + $0xc0] ss:$16 sps:$4 sm:$0xff]   ;;  %v1560_v13 = vld [vmem:[#allocation7 + $0xa4] ss:$16 sps:$4 sm:$0xff]   ;;  %v107_v8 = vlaneseq }
  0x45   :  { %594 = vmatprep.subr.bf16.mxu1 %v1554_v9  ;;  %v1556_v14 = vld [vmem:[#allocation7 + $0xc8] ss:$16 sps:$4 sm:$0xff]   ;;  %v1564_v15 = vld [vmem:[#allocation7 + $0xac] ss:$16 sps:$4 sm:$0xff]   ;;  %v1565_v16 = vld [vmem:[#allocation7 + $0xa0] ss:$16 sps:$4 sm:$0xff]  }
  0x46   :  { %156 = vmatpush1.bf16.msra.mxu0 %v1547_v4  ;;  %v1566_v17 = vld [vmem:[#allocation7 + $0x84] ss:$16 sps:$4 sm:$0xff]   ;;  %v1562_v18 = vld [vmem:[#allocation7 + $0xa8] ss:$16 sps:$4 sm:$0xff]   ;;  %v1570_v19 = vld [vmem:[#allocation7 + $0x8c] ss:$16 sps:$4 sm:$0xff]  }
  0x47   :  { %633 = vmatprep.subr.bf16.mxu0 %v1552_v7  ;;  %v1571_v20 = vld [vmem:[#allocation7 + $0x80] ss:$16 sps:$4 sm:$0xff]   ;;  %v1572_v21 = vld [vmem:[#allocation7 + $0x64] ss:$16 sps:$4 sm:$0xff]   ;;  %v1568_v22 = vld [vmem:[#allocation7 + $0x88] ss:$16 sps:$4 sm:$0xff]  }
  0x48   :  { %595 = vmatpush1.bf16.msra.mxu1 %v1559_v12  ;;  %v1576_v23 = vld [vmem:[#allocation7 + $0x6c] ss:$16 sps:$4 sm:$0xff]   ;;  %v1577_v24 = vld [vmem:[#allocation7 + $0x60] ss:$16 sps:$4 sm:$0xff]   ;;  %v1578_v25 = vld [vmem:[#allocation7 + $0x44] ss:$16 sps:$4 sm:$0xff]  }
  0x49   :  { %1361 = vmatmul.mubr.msk.bf16.vlgmr.msra.gmra.mxu0 %vm137_vm0, %v100_v6  ;;  %596 = vmatprep.subr.bf16.mxu1 %v1560_v13  ;;  %v1574_v26 = vld [vmem:[#allocation7 + $0x68] ss:$16 sps:$4 sm:$0xff]   ;;  %v1582_v27 = vld [vmem:[#allocation7 + $0x4c] ss:$16 sps:$4 sm:$0xff]   ;;  %v1583_v28 = vld [vmem:[#allocation7 + $0x40] ss:$16 sps:$4 sm:$0xff]  }
  0x4a   :  { %634 = vmatpush1.bf16.msra.mxu0 %v1550_v10  ;;  %v1584_v29 = vld [vmem:[#allocation7 + $0x24] ss:$16 sps:$4 sm:$0xff]   ;;  %v1580_v30 = vld [vmem:[#allocation7 + $0x48] ss:$16 sps:$4 sm:$0xff]   ;;  %v1588_v31 = vld [vmem:[#allocation7 + $0x2c] ss:$16 sps:$4 sm:$0xff]  }
  0x4b   :  { %635 = vmatprep.subr.bf16.mxu0 %v1558_v11  ;;  %v1589_v32 = vld [vmem:[#allocation7 + $0x20] ss:$16 sps:$4 sm:$0xff]   ;;  %v1590_v33 = vld [vmem:[#allocation7 + $0x4] ss:$16 sps:$4 sm:$0xff]   ;;  %v1586_v34 = vld [vmem:[#allocation7 + $0x28] ss:$16 sps:$4 sm:$0xff]  }
  0x4c   :  { %597 = vmatpush1.bf16.msra.mxu1 %v1565_v16  ;;  %v1594_v35 = vld [vmem:[#allocation7 + $0xc] ss:$16 sps:$4 sm:$0xff]   ;;  %v1595_v36 = vld [vmem:[#allocation7] ss:$16 sps:$4 sm:$0xff]   ;;  %v1596_v37 = vld [vmem:[#allocation7 + $0x1e4] ss:$16 sps:$4 sm:$0xff]  }
  0x4d   :  { %598 = vmatprep.subr.bf16.mxu1 %v1566_v17  ;;  %v1592_v38 = vld [vmem:[#allocation7 + $0x8] ss:$16 sps:$4 sm:$0xff]   ;;  %v1600_v39 = vld [vmem:[#allocation7 + $0x1ec] ss:$16 sps:$4 sm:$0xff]   ;;  %v1601_v40 = vld [vmem:[#allocation7 + $0x1e0] ss:$16 sps:$4 sm:$0xff]  }
  0x4e   :  { %636 = vmatpush1.bf16.msra.mxu0 %v1556_v14  ;;  %v1602_v41 = vld [vmem:[#allocation7 + $0x1c4] ss:$16 sps:$4 sm:$0xff]   ;;  %v1598_v42 = vld [vmem:[#allocation7 + $0x1e8] ss:$16 sps:$4 sm:$0xff]   ;;  %v1607_v43 = vld [vmem:[#allocation7 + $0x1c0] ss:$16 sps:$4 sm:$0xff]  }
  0x4f   :  { %637 = vmatprep.subr.bf16.mxu0 %v1564_v15  ;;  %v1606_v44 = vld [vmem:[#allocation7 + $0x1cc] ss:$16 sps:$4 sm:$0xff]   ;;  %v1608_v45 = vld [vmem:[#allocation7 + $0x1a4] ss:$16 sps:$4 sm:$0xff]   ;;  %v1604_v46 = vld [vmem:[#allocation7 + $0x1c8] ss:$16 sps:$4 sm:$0xff]  }
  0x50   :  { %599 = vmatpush1.bf16.msra.mxu1 %v1571_v20  ;;  %v1613_v47 = vld [vmem:[#allocation7 + $0x1a0] ss:$16 sps:$4 sm:$0xff]   ;;  %v1612_v48 = vld [vmem:[#allocation7 + $0x1ac] ss:$16 sps:$4 sm:$0xff]   ;;  %v1614_v49 = vld [vmem:[#allocation7 + $0x184] ss:$16 sps:$4 sm:$0xff]  }
  0x51   :  { %600 = vmatprep.subr.bf16.mxu1 %v1572_v21  ;;  %v1610_v50 = vld [vmem:[#allocation7 + $0x1a8] ss:$16 sps:$4 sm:$0xff]   ;;  %v1619_v51 = vld [vmem:[#allocation7 + $0x180] ss:$16 sps:$4 sm:$0xff]   ;;  %v1618_v52 = vld [vmem:[#allocation7 + $0x18c] ss:$16 sps:$4 sm:$0xff]  }
  0x52   :  { %638 = vmatpush1.bf16.msra.mxu0 %v1562_v18  ;;  %v1620_v53 = vld [vmem:[#allocation7 + $0x164] ss:$16 sps:$4 sm:$0xff]   ;;  %v1616_v54 = vld [vmem:[#allocation7 + $0x188] ss:$16 sps:$4 sm:$0xff]   ;;  %v1625_v55 = vld [vmem:[#allocation7 + $0x160] ss:$16 sps:$4 sm:$0xff]  }
  0x53   :  { %639 = vmatprep.subr.bf16.mxu0 %v1570_v19  ;;  %v1624_v56 = vld [vmem:[#allocation7 + $0x16c] ss:$16 sps:$4 sm:$0xff]   ;;  %v1626_v57 = vld [vmem:[#allocation7 + $0x144] ss:$16 sps:$4 sm:$0xff]   ;;  %v1622_v58 = vld [vmem:[#allocation7 + $0x168] ss:$16 sps:$4 sm:$0xff]  }
  0x54   :  { %601 = vmatpush1.bf16.msra.mxu1 %v1577_v24  ;;  %v1631_v59 = vld [vmem:[#allocation7 + $0x140] ss:$16 sps:$4 sm:$0xff]   ;;  %v1630_v60 = vld [vmem:[#allocation7 + $0x14c] ss:$16 sps:$4 sm:$0xff]   ;;  %v1628_v61 = vld [vmem:[#allocation7 + $0x148] ss:$16 sps:$4 sm:$0xff]  }
  0x55   :  { %602 = vmatprep.subr.bf16.mxu1 %v1578_v25  ;;  %v1632_v62 = vld [vmem:[#allocation7 + $0x124] ss:$16 sps:$4 sm:$0xff]   ;;  %v1636_v63 = vld [vmem:[#allocation7 + $0x12c] ss:$16 sps:$4 sm:$0xff]   ;;  %v1634_v0 = vld [vmem:[#allocation7 + $0x128] ss:$16 sps:$4 sm:$0xff]  }
  0x56   :  { %640 = vmatpush1.bf16.msra.mxu0 %v1568_v22  ;;  %v1637_v1 = vld [vmem:[#allocation7 + $0x120] ss:$16 sps:$4 sm:$0xff]   ;;  %v1638_v2 = vld [vmem:[#allocation7 + $0x104] ss:$16 sps:$4 sm:$0xff]   ;;  %v1642_v3 = vld [vmem:[#allocation7 + $0x10c] ss:$16 sps:$4 sm:$0xff]  }
  0x57   :  { %641 = vmatprep.subr.bf16.mxu0 %v1576_v23  ;;  %v1640_v4 = vld [vmem:[#allocation7 + $0x108] ss:$16 sps:$4 sm:$0xff]   ;;  %v1643_v5 = vld [vmem:[#allocation7 + $0x100] ss:$16 sps:$4 sm:$0xff]   ;;  %v1646_v6 = vld [vmem:[#allocation8 + $0x74] ss:$8 sps:$4 sm:$0xff]  }
  0x58   :  { %603 = vmatpush1.bf16.msra.mxu1 %v1583_v28  ;;  %v1649_v7 = vld [vmem:[#allocation8 + $0x174] ss:$8 sps:$4 sm:$0xff]   ;;  %v1962_v9 = vshrl.u32 %v107_v8, 7  ;;  %v1644_v24 = vld [vmem:[#allocation8 + $0x70] ss:$8 sps:$4 sm:$0xff]   ;;  %s1896_s19 = smov [#allocation11]  }
  0x59   :  { %604 = vmatprep.subr.bf16.mxu1 %v1584_v29  ;;  %v105_v11 = vld [vmem:[%s1995_s2] sm:$0x3]  ;;  %v1647_v25 = vld [vmem:[#allocation8 + $0x170] ss:$8 sps:$4 sm:$0xff]   ;;  %v1655_v28 = vld [vmem:[#allocation8 + $0x164] ss:$8 sps:$4 sm:$0xff]  }
  0x5a   :  { %642 = vmatpush1.bf16.msra.mxu0 %v1574_v26  ;;  %v1965_v10 = vsub.s32 0, %v1962_v9  ;;  %v1971_v12 = vsub.s32 1, %v1962_v9  ;;  %v1650_v29 = vld [vmem:[#allocation8 + $0x60] ss:$8 sps:$4 sm:$0xff]   ;;  %v1721_v8 = vld [vmem:[#allocation8 + $0x1b4] ss:$8 sps:$4 sm:$0xff]  }
  0x5b   :  { %643 = vmatprep.subr.bf16.mxu0 %v1582_v27  ;;  %v1652_v27 = vld [vmem:[#allocation8 + $0x64] ss:$8 sps:$4 sm:$0xff]   ;;  %s1346_s20 = sshll.u32 %s1896_s19, 4  ;;  %s1347_s20 = int_to_ptr.vmem [resolvable:$true] %s1346_s20 }
  0x5c   :  { %605 = vmatpush1.bf16.msra.mxu1 %v1589_v32  ;;  %v110_v13 = vrot.slane %v105_v11, %v1965_v10  ;;  %v114_v14 = vrot.slane %v105_v11, %v1971_v12  ;;  %v1661_v32 = vld [vmem:[#allocation8 + $0x154] ss:$8 sps:$4 sm:$0xff]   ;;  %v1716_v11 = vld [vmem:[#allocation8 + $0xb0] ss:$8 sps:$4 sm:$0xff]   ;;  %s1856_s21 = scalar_lea.vmem %s1347_s20, 128  ;;  %p1861_p12 = scmp.lt.s32.totalorder %s1347_s20, %s1347_s20 }
  0x5d   :  { %606 = vmatprep.subr.bf16.mxu1 %v1590_v33  ;;  %v1656_v33 = vld [vmem:[#allocation8 + $0x50] ss:$8 sps:$4 sm:$0xff]   ;;  %p1857_p11 = scmp.ne.s32.totalorder %s1347_s20, %s1856_s21  ;;  %p1862_p13 = scmp.lt.s32.totalorder %s1856_s21, %s1856_s21 }
  0x5e   :  { %644 = vmatpush1.bf16.msra.mxu0 %v1580_v30  ;;  %v1653_v30 = vld [vmem:[#allocation8 + $0x160] ss:$8 sps:$4 sm:$0xff]  }
  0x5f   :  { %645 = vmatprep.subr.bf16.mxu0 %v1588_v31  ;;  %v1658_v31 = vld [vmem:[#allocation8 + $0x54] ss:$8 sps:$4 sm:$0xff]   ;;  %p1863_p0 = por %p1862_p13, %p1861_p12 }
  0x60   :  { %607 = vmatpush1.bf16.msra.mxu1 %v1595_v36  ;;  %v1667_v36 = vld [vmem:[#allocation8 + $0x144] ss:$8 sps:$4 sm:$0xff]  }
  0x61   :  { %608 = vmatprep.subr.bf16.mxu1 %v1596_v37  ;;  %v1662_v37 = vld [vmem:[#allocation8 + $0x40] ss:$8 sps:$4 sm:$0xff]   ;;  %p1864_p1 = pnand %p1863_p0, %p1857_p11 }
  0x62   :  { %646 = vmatpush1.bf16.msra.mxu0 %v1586_v34  ;;  %v1659_v34 = vld [vmem:[#allocation8 + $0x150] ss:$8 sps:$4 sm:$0xff]  }
  0x63   :  { %647 = vmatprep.subr.bf16.mxu0 %v1594_v35  ;;  %v1664_v35 = vld [vmem:[#allocation8 + $0x44] ss:$8 sps:$4 sm:$0xff]  }
  0x64   :  { %609 = vmatpush2.bf16.msra.mxu1 %v1601_v40  ;;  %v1673_v40 = vld [vmem:[#allocation8 + $0x134] ss:$8 sps:$4 sm:$0xff]  }
  0x65   :  { %610 = vmatprep.subr.bf16.mxu1 %v1602_v41  ;;  %v1668_v41 = vld [vmem:[#allocation8 + $0x30] ss:$8 sps:$4 sm:$0xff]  }
  0x66   :  { %648 = vmatpush1.bf16.msra.mxu0 %v1592_v38  ;;  %v1665_v38 = vld [vmem:[#allocation8 + $0x140] ss:$8 sps:$4 sm:$0xff]  }
  0x67   :  { %649 = vmatprep.subr.bf16.mxu0 %v1600_v39  ;;  %v1670_v39 = vld [vmem:[#allocation8 + $0x34] ss:$8 sps:$4 sm:$0xff]  }
  0x68   :  { %611 = vmatpush2.bf16.msra.mxu1 %v1607_v43  ;;  %v1676_v43 = vld [vmem:[#allocation8 + $0x24] ss:$8 sps:$4 sm:$0xff]  }
  0x69   :  { %612 = vmatprep.subr.bf16.mxu1 %v1608_v45  ;;  %v1674_v45 = vld [vmem:[#allocation8 + $0x20] ss:$8 sps:$4 sm:$0xff]  }
  0x6a   :  { %650 = vmatpush2.bf16.msra.mxu0 %v1598_v42  ;;  %v1671_v42 = vld [vmem:[#allocation8 + $0x130] ss:$8 sps:$4 sm:$0xff]  }
  0x6b   :  { %651 = vmatprep.subr.bf16.mxu0 %v1606_v44  ;;  %v1679_v44 = vld [vmem:[#allocation8 + $0x124] ss:$8 sps:$4 sm:$0xff]  }
  0x6c   :  { %613 = vmatpush2.bf16.msra.mxu1 %v1613_v47  ;;  %v1682_v47 = vld [vmem:[#allocation8 + $0x14] ss:$8 sps:$4 sm:$0xff]  }
  0x6d   :  { %614 = vmatprep.subr.bf16.mxu1 %v1614_v49  ;;  %v1680_v49 = vld [vmem:[#allocation8 + $0x10] ss:$8 sps:$4 sm:$0xff]  }
  0x6e   :  { %652 = vmatpush2.bf16.msra.mxu0 %v1604_v46  ;;  %v1677_v46 = vld [vmem:[#allocation8 + $0x120] ss:$8 sps:$4 sm:$0xff]  }
  0x6f   :  { %653 = vmatprep.subr.bf16.mxu0 %v1612_v48  ;;  %v1685_v48 = vld [vmem:[#allocation8 + $0x114] ss:$8 sps:$4 sm:$0xff]  }
  0x70   :  { %615 = vmatpush2.bf16.msra.mxu1 %v1619_v51  ;;  %v1688_v51 = vld [vmem:[#allocation8 + $0x4] ss:$8 sps:$4 sm:$0xff]  }
  0x71   :  { %616 = vmatprep.subr.bf16.mxu1 %v1620_v53  ;;  %v1686_v53 = vld [vmem:[#allocation8] ss:$8 sps:$4 sm:$0xff]  }
  0x72   :  { %654 = vmatpush2.bf16.msra.mxu0 %v1610_v50  ;;  %v1683_v50 = vld [vmem:[#allocation8 + $0x110] ss:$8 sps:$4 sm:$0xff]  }
  0x73   :  { %655 = vmatprep.subr.bf16.mxu0 %v1618_v52  ;;  %v1691_v52 = vld [vmem:[#allocation8 + $0x104] ss:$8 sps:$4 sm:$0xff]  }
  0x74   :  { %617 = vmatpush2.bf16.msra.mxu1 %v1625_v55  ;;  %v1694_v55 = vld [vmem:[#allocation8 + $0xf4] ss:$8 sps:$4 sm:$0xff]  }
  0x75   :  { %618 = vmatprep.subr.bf16.mxu1 %v1626_v57  ;;  %v1692_v57 = vld [vmem:[#allocation8 + $0xf0] ss:$8 sps:$4 sm:$0xff]  }
  0x76   :  { %656 = vmatpush2.bf16.msra.mxu0 %v1616_v54  ;;  %v1689_v54 = vld [vmem:[#allocation8 + $0x100] ss:$8 sps:$4 sm:$0xff]  }
  0x77   :  { %657 = vmatprep.subr.bf16.mxu0 %v1624_v56  ;;  %v1697_v56 = vld [vmem:[#allocation8 + $0x1f4] ss:$8 sps:$4 sm:$0xff]  }
  0x78   :  { %619 = vmatpush2.bf16.msra.mxu1 %v1631_v59  ;;  %v1700_v59 = vld [vmem:[#allocation8 + $0xe4] ss:$8 sps:$4 sm:$0xff]  }
  0x79   :  { %620 = vmatprep.subr.bf16.mxu1 %v1632_v62  ;;  %v1701_v62 = vld [vmem:[#allocation8 + $0x1e0] ss:$8 sps:$4 sm:$0xff]  }
  0x7a   :  { %658 = vmatpush2.bf16.msra.mxu0 %v1622_v58  ;;  %v1695_v58 = vld [vmem:[#allocation8 + $0x1f0] ss:$8 sps:$4 sm:$0xff]  }
  0x7b   :  { %659 = vmatprep.subr.bf16.mxu0 %v1630_v60  ;;  %v1703_v60 = vld [vmem:[#allocation8 + $0x1e4] ss:$8 sps:$4 sm:$0xff]  }
  0x7c   :  { %621 = vmatpush2.bf16.msra.mxu1 %v1637_v1  ;;  %v1704_v1 = vld [vmem:[#allocation8 + $0xd0] ss:$8 sps:$4 sm:$0xff]  }
  0x7d   :  { %622 = vmatprep.subr.bf16.mxu1 %v1638_v2  ;;  %v1707_v2 = vld [vmem:[#allocation8 + $0x1d0] ss:$8 sps:$4 sm:$0xff]  }
  0x7e   :  { %660 = vmatpush2.bf16.msra.mxu0 %v1628_v61  ;;  %v1698_v61 = vld [vmem:[#allocation8 + $0xe0] ss:$8 sps:$4 sm:$0xff]  }
  0x7f   :  { %661 = vmatprep.subr.bf16.mxu0 %v1636_v63  ;;  %v1706_v63 = vld [vmem:[#allocation8 + $0xd4] ss:$8 sps:$4 sm:$0xff]  }
  0x80   :  { %623 = vmatpush2.bf16.msra.mxu1 %v1643_v5  ;;  %v1710_v5 = vld [vmem:[#allocation8 + $0xc0] ss:$8 sps:$4 sm:$0xff]  }
  0x81   :  { %1078 = vmatprep.subr.bf16.mxu1 %v1646_v6  ;;  %v1713_v6 = vld [vmem:[#allocation8 + $0x1c0] ss:$8 sps:$4 sm:$0xff]  }
  0x82   :  { %662 = vmatpush2.bf16.msra.mxu0 %v1634_v0  ;;  %v1709_v0 = vld [vmem:[#allocation8 + $0x1d4] ss:$8 sps:$4 sm:$0xff]  }
  0x83   :  { %663 = vmatprep.subr.bf16.mxu0 %v1642_v3  ;;  %v1712_v3 = vld [vmem:[#allocation8 + $0xc4] ss:$8 sps:$4 sm:$0xff]  }
  0x86   :  { %664 = vmatpush2.bf16.msra.mxu0 %v1640_v4  ;;  %v1715_v4 = vld [vmem:[#allocation8 + $0x1c4] ss:$8 sps:$4 sm:$0xff]  }
  0x87   :  { %1119 = vmatprep.subr.bf16.mxu0 %v1649_v7  ;;  %v1718_v7 = vld [vmem:[#allocation8 + $0xb4] ss:$8 sps:$4 sm:$0xff]  }
 0x109   :  { %v175_v15 = vpop.f32.mrf.mxu0 }
 0x10a   :  { %v176_v16 = vadd.f32 %v175_v15, %v110_v13  ;;  %v1719_v13 = vld [vmem:[#allocation8 + $0x1b0] ss:$8 sps:$4 sm:$0xff]   ;;  %v1727_v15 = vld [vmem:[#allocation8 + $0x1a4] ss:$8 sps:$4 sm:$0xff]  }
 0x10b   :  { %v177_v17 = vpop.f32.mrf.mxu0 }
 0x10c   :  { %v178_v18 = vadd.f32 %v177_v17, %v114_v14  ;;  %v182_v19 = vmax.f32 %v176_v16, 0.0  ;;  %v1724_v14 = vld [vmem:[#allocation8 + $0xa4] ss:$8 sps:$4 sm:$0xff]   ;;  %v1722_v16 = vld [vmem:[#allocation8 + $0xa0] ss:$8 sps:$4 sm:$0xff]  }
 0x10d   :  { %v179_v20 = vpop.f32.mrf.mxu0  ;;  %v1725_v17 = vld [vmem:[#allocation8 + $0x1a0] ss:$8 sps:$4 sm:$0xff]  }
 0x10e   :  { %v183_v21 = vmax.f32 %v178_v18, 0.0  ;;  %v184_v26 = vpack.c.bf16 %v182_v19, %v182_v19  ;;  %v1730_v18 = vld [vmem:[#allocation8 + $0x94] ss:$8 sps:$4 sm:$0xff]   ;;  %v1728_v20 = vld [vmem:[#allocation8 + $0x90] ss:$8 sps:$4 sm:$0xff]  }
 0x10f   :  { %v180_v22 = vpop.f32.mrf.mxu0  ;;  %v1733_v19 = vld [vmem:[#allocation8 + $0x194] ss:$8 sps:$4 sm:$0xff]  }
 0x110   :  { %v185_v23 = vpack.c.bf16 %v183_v21, %v183_v21  ;;  %v1731_v21 = vld [vmem:[#allocation8 + $0x190] ss:$8 sps:$4 sm:$0xff]   ;;  %v1736_v22 = vld [vmem:[#allocation8 + $0x84] ss:$8 sps:$4 sm:$0xff]  }
 0x112   :  { %624 = vmatprep.mubr.bf16.mxu1 %v185_v23  ;;  %665 = vmatprep.mubr.bf16.mxu0 %v185_v23  ;;  %v1739_v23 = vld [vmem:[#allocation8 + $0x184] ss:$8 sps:$4 sm:$0xff]  }
 0x113   :  { %625 = vmatmul.mubr.bf16.vlgmr.msra.gmra.mxu1 %v184_v26  ;;  %666 = vmatmul.mubr.bf16.vlgmr.msra.gmra.mxu0 %v184_v26  ;;  %v1740_v26 = vld [vmem:[#allocation10 + $0x78] sm:$0xff]  }
 0x114   :  { %1079 = vmatpush1.bf16.msra.mxu1 %v1644_v24  ;;  %1120 = vmatpush1.bf16.msra.mxu0 %v1647_v25  ;;  %v1734_v24 = vld [vmem:[#allocation8 + $0x80] ss:$8 sps:$4 sm:$0xff]  }
 0x115   :  { %1080 = vmatprep.subr.bf16.mxu1 %v1652_v27  ;;  %1121 = vmatprep.subr.bf16.mxu0 %v1655_v28  ;;  %v1737_v25 = vld [vmem:[#allocation8 + $0x180] ss:$8 sps:$4 sm:$0xff]   ;;  %v262_v27 = vsub.s32 2, %v1962_v9  ;;  %v250_v28 = vld [vmem:[%s1997_s4] sm:$0xf] }
 0x118   :  { %1081 = vmatpush1.bf16.msra.mxu1 %v1650_v29  ;;  %1122 = vmatpush1.bf16.msra.mxu0 %v1653_v30  ;;  %v266_v29 = vsub.s32 3, %v1962_v9  ;;  %v255_v30 = vrot.slane %v250_v28, %v1965_v10 }
 0x119   :  { %1082 = vmatprep.subr.bf16.mxu1 %v1658_v31  ;;  %1123 = vmatprep.subr.bf16.mxu0 %v1661_v32  ;;  %v263_v31 = vrot.slane %v250_v28, %v262_v27  ;;  %v259_v32 = vrot.slane %v250_v28, %v1971_v12 }
 0x11c   :  { %1083 = vmatpush1.bf16.msra.mxu1 %v1656_v33  ;;  %1124 = vmatpush1.bf16.msra.mxu0 %v1659_v34  ;;  %v267_v33 = vrot.slane %v250_v28, %v266_v29 }
 0x11d   :  { %1084 = vmatprep.subr.bf16.mxu1 %v1664_v35  ;;  %1125 = vmatprep.subr.bf16.mxu0 %v1667_v36 }
 0x120   :  { %1085 = vmatpush1.bf16.msra.mxu1 %v1662_v37  ;;  %1126 = vmatpush1.bf16.msra.mxu0 %v1665_v38 }
 0x121   :  { %1086 = vmatprep.subr.bf16.mxu1 %v1670_v39  ;;  %1127 = vmatprep.subr.bf16.mxu0 %v1673_v40 }
 0x124   :  { %1087 = vmatpush1.bf16.msra.mxu1 %v1668_v41  ;;  %1128 = vmatpush1.bf16.msra.mxu0 %v1671_v42 }
 0x125   :  { %1088 = vmatprep.subr.bf16.mxu1 %v1676_v43  ;;  %1129 = vmatprep.subr.bf16.mxu0 %v1679_v44 }
 0x128   :  { %1089 = vmatpush1.bf16.msra.mxu1 %v1674_v45  ;;  %1130 = vmatpush1.bf16.msra.mxu0 %v1677_v46 }
 0x129   :  { %1090 = vmatprep.subr.bf16.mxu1 %v1682_v47  ;;  %1131 = vmatprep.subr.bf16.mxu0 %v1685_v48 }
 0x12c   :  { %1091 = vmatpush1.bf16.msra.mxu1 %v1680_v49  ;;  %1132 = vmatpush1.bf16.msra.mxu0 %v1683_v50 }
 0x12d   :  { %1092 = vmatprep.subr.bf16.mxu1 %v1688_v51  ;;  %1133 = vmatprep.subr.bf16.mxu0 %v1691_v52  ;;  %v1741_v51 = vld [vmem:[#allocation10 + $0x38] sm:$0xff]  }
 0x130   :  { %1093 = vmatpush1.bf16.msra.mxu1 %v1686_v53  ;;  %1134 = vmatpush1.bf16.msra.mxu0 %v1689_v54  ;;  %v1742_v54 = vld [vmem:[#allocation10 + $0x70] sm:$0xff]  }
 0x131   :  { %1094 = vmatprep.subr.bf16.mxu1 %v1694_v55  ;;  %1135 = vmatprep.subr.bf16.mxu0 %v1697_v56  ;;  %v1743_v55 = vld [vmem:[#allocation10 + $0x30] sm:$0xff]   ;;  %v1744_v56 = vld [vmem:[#allocation10 + $0x68] sm:$0xff]  }
 0x134   :  { %1095 = vmatpush2.bf16.msra.mxu1 %v1692_v57  ;;  %1136 = vmatpush2.bf16.msra.mxu0 %v1695_v58  ;;  %v1745_v57 = vld [vmem:[#allocation10 + $0x28] sm:$0xff]   ;;  %v1746_v58 = vld [vmem:[#allocation10 + $0x60] sm:$0xff]  }
 0x135   :  { %1096 = vmatprep.subr.bf16.mxu1 %v1700_v59  ;;  %1137 = vmatprep.subr.bf16.mxu0 %v1703_v60  ;;  %v1747_v59 = vld [vmem:[#allocation10 + $0x20] sm:$0xff]   ;;  %v1748_v60 = vld [vmem:[#allocation10 + $0x58] sm:$0xff]  }
 0x138   :  { %1097 = vmatpush2.bf16.msra.mxu1 %v1698_v61  ;;  %1138 = vmatpush2.bf16.msra.mxu0 %v1701_v62  ;;  %v1749_v61 = vld [vmem:[#allocation10 + $0x18] sm:$0xff]   ;;  %v1750_v62 = vld [vmem:[#allocation10 + $0x50] sm:$0xff]  }
 0x139   :  { %1098 = vmatprep.subr.bf16.mxu1 %v1706_v63  ;;  %1139 = vmatprep.subr.bf16.mxu0 %v1709_v0  ;;  %v1751_v63 = vld [vmem:[#allocation10 + $0x10] sm:$0xff]   ;;  %v1752_v0 = vld [vmem:[#allocation10 + $0x48] sm:$0xff]  }
 0x13c   :  { %1099 = vmatpush2.bf16.msra.mxu1 %v1704_v1  ;;  %1140 = vmatpush2.bf16.msra.mxu0 %v1707_v2  ;;  %v1753_v1 = vld [vmem:[#allocation10 + $0x8] sm:$0xff]   ;;  %v1754_v2 = vld [vmem:[#allocation10 + $0x40] sm:$0xff]  }
 0x13d   :  { %1100 = vmatprep.subr.bf16.mxu1 %v1712_v3  ;;  %1141 = vmatprep.subr.bf16.mxu0 %v1715_v4  ;;  %v1755_v3 = vld [vmem:[#allocation10] sm:$0xff]   ;;  %v746_v4 = vld [vmem:[%s1999_s6] sm:$0x3] }
 0x140   :  { %1101 = vmatpush2.bf16.msra.mxu1 %v1710_v5  ;;  %1142 = vmatpush2.bf16.msra.mxu0 %v1713_v6  ;;  %v751_v5 = vrot.slane %v746_v4, %v1965_v10  ;;  %v755_v6 = vrot.slane %v746_v4, %v1971_v12  ;;  %v1490_v12 = vld [vmem:[%s2001_s8] ss:$0 sm:$0xff] }
 0x141   :  { %1102 = vmatprep.subr.bf16.mxu1 %v1718_v7  ;;  %1143 = vmatprep.subr.bf16.mxu0 %v1721_v8 }
 0x144   :  { %1103 = vmatpush2.bf16.msra.mxu1 %v1716_v11  ;;  %1144 = vmatpush2.bf16.msra.mxu0 %v1719_v13 }
 0x145   :  { %1104 = vmatprep.subr.bf16.mxu1 %v1724_v14  ;;  %1145 = vmatprep.subr.bf16.mxu0 %v1727_v15 }
 0x148   :  { %1105 = vmatpush2.bf16.msra.mxu1 %v1722_v16  ;;  %1146 = vmatpush2.bf16.msra.mxu0 %v1725_v17 }
 0x149   :  { %1106 = vmatprep.subr.bf16.mxu1 %v1730_v18  ;;  %1147 = vmatprep.subr.bf16.mxu0 %v1733_v19 }
 0x14c   :  { %1107 = vmatpush2.bf16.msra.mxu1 %v1728_v20  ;;  %1148 = vmatpush2.bf16.msra.mxu0 %v1731_v21 }
 0x14d   :  { %1108 = vmatprep.subr.bf16.mxu1 %v1736_v22  ;;  %1149 = vmatprep.subr.bf16.mxu0 %v1739_v23 }
 0x150   :  { %1109 = vmatpush2.bf16.msra.mxu1 %v1734_v24  ;;  %1150 = vmatpush2.bf16.msra.mxu0 %v1737_v25 }
 0x151   :  { %1507 = vmatprep.subr.bf16.mxu1 %v1740_v26 }
 0x1d3   :  { %v626_v34 = vpop.f32.mrf.mxu1  ;;  %v667_v35 = vpop.f32.mrf.mxu0 }
 0x1d4   :  { %v627_v36 = vadd.f32 %v626_v34, %v255_v30  ;;  %v668_v37 = vadd.f32 %v667_v35, %v263_v31 }
 0x1d5   :  { %v628_v38 = vpop.f32.mrf.mxu1  ;;  %v669_v39 = vpop.f32.mrf.mxu0 }
 0x1d6   :  { %v629_v40 = vadd.f32 %v628_v38, %v259_v32  ;;  %v670_v41 = vadd.f32 %v669_v39, %v267_v33  ;;  %v674_v42 = vmax.f32 %v627_v36, 0.0  ;;  %v676_v43 = vmax.f32 %v668_v37, 0.0 }
 0x1d7   :  { %v630_v44 = vpop.f32.mrf.mxu1  ;;  %v671_v45 = vpop.f32.mrf.mxu0 }
 0x1d8   :  { %v675_v46 = vmax.f32 %v629_v40, 0.0  ;;  %v677_v9 = vmax.f32 %v670_v41, 0.0  ;;  %v678_v52 = vpack.c.bf16 %v674_v42, %v674_v42  ;;  %v680_v53 = vpack.c.bf16 %v676_v43, %v676_v43 }
 0x1d9   :  { %v631_v47 = vpop.f32.mrf.mxu1  ;;  %v672_v48 = vpop.f32.mrf.mxu0 }
 0x1da   :  { %v679_v49 = vpack.c.bf16 %v675_v46, %v675_v46  ;;  %v681_v50 = vpack.c.bf16 %v677_v9, %v677_v9 }
 0x1dc   :  { %1110 = vmatprep.mubr.bf16.mxu1 %v679_v49  ;;  %1151 = vmatprep.mubr.bf16.mxu0 %v681_v50 }
 0x1dd   :  { %1111 = vmatmul.mubr.bf16.vlgmr.msra.gmra.mxu1 %v678_v52  ;;  %1152 = vmatmul.mubr.bf16.vlgmr.msra.gmra.mxu0 %v680_v53 }
 0x1de   :  { %1508 = vmatpush3.bf16.msra.mxu1 %v1741_v51 }
 0x1df   :  { %1509 = vmatprep.subr.bf16.mxu1 %v1742_v54 }
 0x1e2   :  { %1510 = vmatpush3.bf16.msra.mxu1 %v1743_v55 }
 0x1e3   :  { %1511 = vmatprep.subr.bf16.mxu1 %v1744_v56 }
 0x1e6   :  { %1512 = vmatpush3.bf16.msra.mxu1 %v1745_v57 }
 0x1e7   :  { %1513 = vmatprep.subr.bf16.mxu1 %v1746_v58 }
 0x1ea   :  { %1514 = vmatpush3.bf16.msra.mxu1 %v1747_v59 }
 0x1eb   :  { %1515 = vmatprep.subr.bf16.mxu1 %v1748_v60 }
 0x1ee   :  { %1516 = vmatpush3.bf16.msra.mxu1 %v1749_v61 }
 0x1ef   :  { %1517 = vmatprep.subr.bf16.mxu1 %v1750_v62 }
 0x1f2   :  { %1518 = vmatpush3.bf16.msra.mxu1 %v1751_v63 }
 0x1f3   :  { %1519 = vmatprep.subr.bf16.mxu1 %v1752_v0 }
 0x1f6   :  { %1520 = vmatpush3.bf16.msra.mxu1 %v1753_v1 }
 0x1f7   :  { %1521 = vmatprep.subr.bf16.mxu1 %v1754_v2 }
 0x1fa   :  { %1522 = vmatpush3.bf16.msra.mxu1 %v1755_v3 }
 0x29d   :  { %v1112_v7 = vpop.f32.mrf.mxu1  ;;  %v1153_v8 = vpop.f32.mrf.mxu0 }
 0x29e   :  { %v1113_v11 = vadd.f32 %v1112_v7, %v751_v5 }
 0x29f   :  { %v1114_v13 = vpop.f32.mrf.mxu1  ;;  %v1155_v14 = vpop.f32.mrf.mxu0 }
 0x2a0   :  { %v1154_v15 = vadd.f32 %v1153_v8, %v1113_v11  ;;  %v1115_v16 = vadd.f32 %v1114_v13, %v755_v6 }
 0x2a1   :  { %v1116_v17 = vpop.f32.mrf.mxu1  ;;  %v1157_v18 = vpop.f32.mrf.mxu0 }
 0x2a2   :  { %v1156_v19 = vadd.f32 %v1155_v14, %v1115_v16  ;;  %v1160_v20 = vmax.f32 %v1154_v15, 0.0 }
 0x2a3   :  { %v1117_v21 = vpop.f32.mrf.mxu1  ;;  %v1158_v22 = vpop.f32.mrf.mxu0 }
 0x2a4   :  { %v1161_v23 = vmax.f32 %v1156_v19, 0.0  ;;  %v1162_v25 = vpack.c.bf16 %v1160_v20, %v1160_v20 }
 0x2a6   :  { %v1163_v24 = vpack.c.bf16 %v1161_v23, %v1161_v23 }
 0x2a8   :  { %1331 = vmatprep.mubr.bf16.mxu1 %v1163_v24 }
 0x2a9   :  { %1332 = vmatmul.mubr.bf16.vlgmr.msra.gmra.mxu1 %v1162_v25 }
 0x369   :  { %v1523_v10 = vpop.f32.mrf.mxu1 }
 0x36b   :  { %v1524_v26 = vpop.f32.mrf.mxu1 }
 0x36c   :  { %v1525_v27 = vadd.f32 %v1524_v26, %v1523_v10 }
 0x36d   :  { %v1526_v28 = vpop.f32.mrf.mxu1 }
 0x36e   :  { %v1334_v29 = vadd.f32 %v1525_v27, %v1490_v12 }
 0x36f   :  { %v1527_v30 = vpop.f32.mrf.mxu1 }
 0x370   :  { %1339 = vst [vmem:[#allocation11] sm:$0xff] %v1334_v29 }
 0x371   :  { %1867 = shalt.err (!%p1864_p1)
}
 0x372   :  { %1349 = dma.vmem_to_hbm [thread:$0]  %s1347_s20, 128, %s2002_s9, [#allocation4]  }
 0x373   :  { %1882 = dma.done.wait [#allocation4], 128  }
 0x374   :  { %1883 = vsyncadd [#allocation4], 4294967168 }
 0x375   :  { %1353 = vsyncpa [#allocation3], 1 }
 0x376   :  { %1354 = vsyncpa [#allocation6], 1 }
 0x377   :  { %1355 = vsyncpa [#allocation9], 1 }
 0x378   :  { %1356 = vsyncpa [#allocation4], 1 }

</bundles_post_ra>
